<compile_context>
chip_gen: v5e
topology: v5e:2x2
jax: 0.10.0
libtpu: 0.0.40
codegen_flags: <defaults>
</compile_context>

<pallas_src>
import functools

import jax
import jax.numpy as jnp
from jax import lax
from jax.experimental import pallas as pl
from jax.experimental.pallas import tpu as pltpu


def _round_up(x, m):
    return (x + m - 1) // m * m


# ---------------------------- Pallas kernels ----------------------------

def _conv_matmul_kernel(p_ref, w_ref, y_ref, stats_ref, acc_ref):
    """K-tiled im2col matmul with fused column-stats epilogue.

    grid = (m_tiles, c_tiles, k_tiles); the reduction axis (k) is last and
    marked "arbitrary"; output blocks are revisited across k.
    """
    k = pl.program_id(2)

    @pl.when(k == 0)
    def _():
        acc_ref[...] = jnp.zeros_like(acc_ref)

    acc_ref[...] += jnp.dot(p_ref[...], w_ref[...],
                            preferred_element_type=jnp.float32)

    @pl.when(k == pl.num_programs(2) - 1)
    def _():
        y = acc_ref[...]
        y_ref[...] = y.astype(y_ref.dtype)
        # Per-(row-tile, channel) partial sums for BatchNorm batch statistics.
        # Padded (all-zero) rows / columns contribute exactly zero.
        s = jnp.sum(y, axis=0, keepdims=True)         # (1, TC)
        ss = jnp.sum(y * y, axis=0, keepdims=True)    # (1, TC)
        rows = lax.broadcasted_iota(jnp.int32, stats_ref.shape, 0)
        stats_ref[...] = jnp.where(rows == 0, s, jnp.where(rows == 1, ss, 0.0))


def _scale_shift_relu_kernel(y_ref, scale_ref, shift_ref, o_ref, *, use_relu):
    y = y_ref[...] * scale_ref[...] + shift_ref[...]
    if use_relu:
        y = jnp.maximum(y, 0.0)
    o_ref[...] = y.astype(o_ref.dtype)


# ------------------------------- wrapper ---------------------------------

def basic_conv_forward(x, weight, conv_bias, gamma, beta, *,
                       stride=1, padding=0, dilation=1, groups=1,
                       relu=True, bn=True, eps=1e-5):
    assert groups == 1  # TODO(synk): grouped conv not implemented in the matmul lowering
    N, C_in, H, W = x.shape
    C_out, _, kh, kw = weight.shape

    H_out = (H + 2 * padding - dilation * (kh - 1) - 1) // stride + 1
    W_out = (W + 2 * padding - dilation * (kw - 1) - 1) // stride + 1

    # ---- channels-last im2col (plain-JAX glue: static slices + concat) ----
    # TODO(synk): replace with an implicit-GEMM kernel (loop over the kh*kw
    # taps with shifted NHWC DMAs) to remove the kh*kw HBM read amplification.
    x_nhwc = jnp.transpose(x, (0, 2, 3, 1))
    xp = jnp.pad(x_nhwc,
                 ((0, 0), (padding, padding), (padding, padding), (0, 0)))
    cols = []
    for i in range(kh):
        for j in range(kw):
            hi, wj = i * dilation, j * dilation
            cols.append(xp[:, hi:hi + (H_out - 1) * stride + 1:stride,
                            wj:wj + (W_out - 1) * stride + 1:stride, :])
    patches = jnp.concatenate(cols, axis=-1)        # K order = (kh, kw, C_in)
    patches = patches.reshape(N * H_out * W_out, kh * kw * C_in)
    # Weight flattened in the matching (kh, kw, C_in) order -> [K, C_out].
    w2d = weight.transpose(2, 3, 1, 0).reshape(kh * kw * C_in, C_out)

    M, K = patches.shape

    # ---- tiling: 128-lane multiples, big M tiles, K & C_out tiled ----
    TM = min(512, _round_up(M, 128))
    TK = min(512, _round_up(K, 128))
    TC = min(256, _round_up(C_out, 128))
    Mp = _round_up(M, TM)
    Kp = _round_up(K, TK)
    Cp = _round_up(C_out, TC)
    n_m, n_c, n_k = Mp // TM, Cp // TC, Kp // TK

    # bf16 MXU inputs, f32 accumulation: halves HBM/VMEM traffic, 2x+ MXU rate.
    patches_p = jnp.pad(patches, ((0, Mp - M), (0, Kp - K))).astype(jnp.bfloat16)
    w_p = jnp.pad(w2d, ((0, Kp - K), (0, Cp - C_out))).astype(jnp.bfloat16)

    y2d, stats = pl.pallas_call(
        _conv_matmul_kernel,
        out_shape=(jax.ShapeDtypeStruct((Mp, Cp), jnp.float32),
                   jax.ShapeDtypeStruct((n_m * 8, Cp), jnp.float32)),
        grid=(n_m, n_c, n_k),
        in_specs=[pl.BlockSpec((TM, TK), lambda i, j, k: (i, k)),
                  pl.BlockSpec((TK, TC), lambda i, j, k: (k, j))],
        out_specs=[pl.BlockSpec((TM, TC), lambda i, j, k: (i, j)),
                   pl.BlockSpec((8, TC), lambda i, j, k: (i, j))],
        scratch_shapes=[pltpu.VMEM((TM, TC), jnp.float32)],
        compiler_params=pltpu.CompilerParams(
            dimension_semantics=("parallel", "parallel", "arbitrary"),
            vmem_limit_bytes=48 * 1024 * 1024),
    )(patches_p, w_p)

    # ---- fold conv bias / BN batch-stats into per-channel scale & shift ----
    if bn:
        stats3 = stats.reshape(n_m, 8, Cp)
        col_sum = jnp.sum(stats3[:, 0, :], axis=0)
        col_sumsq = jnp.sum(stats3[:, 1, :], axis=0)
        mean = col_sum / M
        # f32 E[y^2] - E[y]^2 (biased var, as PyTorch uses for normalization);
        # clamp tiny negatives from cancellation.
        var = jnp.maximum(col_sumsq / M - mean * mean, 0.0)
        gamma_p = jnp.pad(gamma, (0, Cp - C_out), constant_values=1.0)
        beta_p = jnp.pad(beta, (0, Cp - C_out))
        scale = gamma_p.astype(jnp.float32) * lax.rsqrt(var + eps)
        shift = beta_p.astype(jnp.float32) - mean * scale
        # The conv bias (if any) is exactly cancelled by mean subtraction.
    else:
        scale = jnp.ones((Cp,), jnp.float32)
        shift = jnp.pad(conv_bias, (0, Cp - C_out)).astype(jnp.float32)
    scale = scale.reshape(1, Cp)
    shift = shift.reshape(1, Cp)

    # ---- row-tiled fused scale/shift (+ReLU): one read + one write of y ----
    TMA = min(512, Mp)
    out2d = pl.pallas_call(
        functools.partial(_scale_shift_relu_kernel, use_relu=relu),
        out_shape=jax.ShapeDtypeStruct((Mp, Cp), jnp.float32),
        grid=(Mp // TMA,),
        in_specs=[pl.BlockSpec((TMA, Cp), lambda i: (i, 0)),
                  pl.BlockSpec((1, Cp), lambda i: (0, 0)),
                  pl.BlockSpec((1, Cp), lambda i: (0, 0))],
        out_specs=pl.BlockSpec((TMA, Cp), lambda i: (i, 0)),
        compiler_params=pltpu.CompilerParams(
            dimension_semantics=("parallel",),
            vmem_limit_bytes=32 * 1024 * 1024),
    )(y2d, scale, shift)

    # NCHW for PyTorch parity.  TODO(synk): keep channels-last (NHWC) if the
    # consumer accepts it — this final transpose is an extra HBM pass.
    out = out2d[:M, :C_out].reshape(N, H_out, W_out, C_out)
    return out.transpose(0, 3, 1, 2)


# ---------------------------- reference (JAX) ----------------------------

def basic_conv_reference(x, weight, conv_bias, gamma, beta, *,
                         stride=1, padding=0, dilation=1,
                         relu=True, bn=True, eps=1e-5):
    y = lax.conv_general_dilated(
        x, weight, window_strides=(stride, stride),
        padding=((padding, padding), (padding, padding)),
        rhs_dilation=(dilation, dilation),
        dimension_numbers=("NCHW", "OIHW", "NCHW"))
    y = y + conv_bias.reshape(1, -1, 1, 1)
    if bn:
        mean = y.mean(axis=(0, 2, 3), keepdims=True)
        var = ((y - mean) ** 2).mean(axis=(0, 2, 3), keepdims=True)
        y = (y - mean) / jnp.sqrt(var + eps) * gamma.reshape(1, -1, 1, 1) \
            + beta.reshape(1, -1, 1, 1)
    if relu:
        y = jnp.maximum(y, 0.0)
    return y


# --------------------------------- main ----------------------------------

if __name__ == "__main__":
    # BasicConv(in_planes=4, out_planes=8, kernel_size=3, stride=1, padding=1)
    N, C_in, H, W = 2, 4, 16, 16
    C_out, kh, kw = 8, 3, 3
    stride, padding, dilation = 1, 1, 1

    key = jax.random.PRNGKey(0)
    kx, kw_ = jax.random.split(key)
    x = jax.random.normal(kx, (N, C_in, H, W), dtype=jnp.float32)
    weight = jax.random.normal(kw_, (C_out, C_in, kh, kw),
                               dtype=jnp.float32) * 0.1
    conv_bias = jnp.zeros((C_out,), jnp.float32)          # bias=False default
    gamma = 1.0 + 0.1 * jnp.arange(C_out, dtype=jnp.float32)   # BN weight
    beta = 0.05 * jnp.arange(C_out, dtype=jnp.float32)         # BN bias

    out = basic_conv_forward(x, weight, conv_bias, gamma, beta,
                             stride=stride, padding=padding,
                             dilation=dilation, relu=True, bn=True)
    out = jax.block_until_ready(out)

    ref = basic_conv_reference(x, weight, conv_bias, gamma, beta,
                               stride=stride, padding=padding,
                               dilation=dilation, relu=True, bn=True)

    assert out.shape == (N, C_out, H, W), out.shape
    # Kernel uses bf16 MXU inputs (f32 accumulate); compare against the f32
    # reference with a mixed-precision tolerance.
    assert jnp.allclose(out, ref, atol=5e-2, rtol=5e-2), \
        float(jnp.max(jnp.abs(out - ref)))
    print("KERNEL_OK")
</pallas_src>

<mosaic_0001>
module attributes {stable_mosaic.version = 11 : i64} {
  func.func @_conv_matmul_kernel(%arg0: i32, %arg1: i32, %arg2: i32, %arg3: memref<512x128xbf16, #tpu.memory_space<vmem>>, %arg4: memref<128x128xbf16, #tpu.memory_space<vmem>>, %arg5: memref<512x128xf32, #tpu.memory_space<vmem>>, %arg6: memref<8x128xf32, #tpu.memory_space<vmem>>, %arg7: memref<512x128xf32, #tpu.memory_space<vmem>>) attributes {dimension_semantics = [#tpu.dimension_semantics<parallel>, #tpu.dimension_semantics<parallel>, #tpu.dimension_semantics<arbitrary>], iteration_bounds = array<i64: 1, 1, 1>, scalar_prefetch = 0 : i64, scratch_operands = 1 : i64, tpu.core_type = #tpu.core_type<tc>, window_params = [{transform_indices = @transform_0, window_bounds = array<i64: 512, 128>}, {transform_indices = @transform_1, window_bounds = array<i64: 128, 128>}, {transform_indices = @transform_2, window_bounds = array<i64: 512, 128>}, {transform_indices = @transform_3, window_bounds = array<i64: 8, 128>}]} {
    %c0_i32 = arith.constant 0 : i32
    %0 = arith.cmpi eq, %arg2, %c0_i32 : i32
    %1 = arith.extui %0 : i1 to i32
    %c0_i32_0 = arith.constant 0 : i32
    %2 = arith.cmpi ne, %1, %c0_i32_0 : i32
    scf.if %2 {
      %cst_10 = arith.constant 0.000000e+00 : f32
      %12 = vector.broadcast %cst_10 : f32 to vector<512x128xf32>
      %c0_11 = arith.constant 0 : index
      %c0_12 = arith.constant 0 : index
      %13 = vector.load %arg7[%c0_11, %c0_12] : memref<512x128xf32, #tpu.memory_space<vmem>>, vector<512x128xf32>
      tpu.vector_store %arg7[%c0_11, %c0_12], %12 {strides = array<i32>} : memref<512x128xf32, #tpu.memory_space<vmem>>, vector<512x128xf32>,
    } else {
    }
    %c0 = arith.constant 0 : index
    %c0_1 = arith.constant 0 : index
    %3 = vector.load %arg7[%c0, %c0_1] : memref<512x128xf32, #tpu.memory_space<vmem>>, vector<512x128xf32>
    %c0_2 = arith.constant 0 : index
    %c0_3 = arith.constant 0 : index
    %4 = vector.load %arg3[%c0_2, %c0_3] : memref<512x128xbf16, #tpu.memory_space<vmem>>, vector<512x128xbf16>
    %c0_4 = arith.constant 0 : index
    %c0_5 = arith.constant 0 : index
    %5 = vector.load %arg4[%c0_4, %c0_5] : memref<128x128xbf16, #tpu.memory_space<vmem>>, vector<128x128xbf16>
    %cst = arith.constant dense<0.000000e+00> : vector<512x128xf32>
    %6 = tpu.matmul %4, %5, %cst {dimension_numbers = #tpu.dot_dimension_numbers<[1], [0], [0], [1], [0, 0, 1, 1], [], []>} : vector<512x128xbf16>, vector<128x128xbf16>, vector<512x128xf32> -> vector<512x128xf32>
    %7 = arith.addf %3, %6 : vector<512x128xf32>
    %c0_6 = arith.constant 0 : index
    %c0_7 = arith.constant 0 : index
    %8 = vector.load %arg7[%c0_6, %c0_7] : memref<512x128xf32, #tpu.memory_space<vmem>>, vector<512x128xf32>
    tpu.vector_store %arg7[%c0_6, %c0_7], %7 {strides = array<i32>} : memref<512x128xf32, #tpu.memory_space<vmem>>, vector<512x128xf32>,
    %c0_i32_8 = arith.constant 0 : i32
    %9 = arith.cmpi eq, %arg2, %c0_i32_8 : i32
    %10 = arith.extui %9 : i1 to i32
    %c0_i32_9 = arith.constant 0 : i32
    %11 = arith.cmpi ne, %10, %c0_i32_9 : i32
    scf.if %11 {
      %c0_10 = arith.constant 0 : index
      %c0_11 = arith.constant 0 : index
      %12 = vector.load %arg7[%c0_10, %c0_11] : memref<512x128xf32, #tpu.memory_space<vmem>>, vector<512x128xf32>
      %c0_12 = arith.constant 0 : index
      %c0_13 = arith.constant 0 : index
      %13 = vector.load %arg5[%c0_12, %c0_13] : memref<512x128xf32, #tpu.memory_space<vmem>>, vector<512x128xf32>
      tpu.vector_store %arg5[%c0_12, %c0_13], %12 {strides = array<i32>} : memref<512x128xf32, #tpu.memory_space<vmem>>, vector<512x128xf32>,
      %cst_14 = arith.constant dense<0.000000e+00> : vector<128xf32>
      %14 = vector.multi_reduction <add>, %12, %cst_14 [0] : vector<512x128xf32> to vector<128xf32>
      %15 = vector.shape_cast %14 : vector<128xf32> to vector<1x128xf32>
      %16 = arith.mulf %12, %12 : vector<512x128xf32>
      %cst_15 = arith.constant dense<0.000000e+00> : vector<128xf32>
      %17 = vector.multi_reduction <add>, %16, %cst_15 [0] : vector<512x128xf32> to vector<128xf32>
      %18 = vector.shape_cast %17 : vector<128xf32> to vector<1x128xf32>
      %19 = tpu.iota {dimensions = array<i32: 0>} : vector<8x128xi32>
      %c0_i32_16 = arith.constant 0 : i32
      %20 = vector.broadcast %c0_i32_16 : i32 to vector<8x128xi32>
      %21 = arith.cmpi eq, %19, %20 : vector<8x128xi32>
      %c1_i32 = arith.constant 1 : i32
      %22 = vector.broadcast %c1_i32 : i32 to vector<8x128xi32>
      %23 = arith.cmpi eq, %19, %22 : vector<8x128xi32>
      %cst_17 = arith.constant 0.000000e+00 : f32
      %24 = vector.shape_cast %18 : vector<1x128xf32> to vector<1x128xf32>
      %25 = vector.broadcast %24 : vector<1x128xf32> to vector<8x128xf32>
      %26 = vector.broadcast %cst_17 : f32 to vector<8x128xf32>
      %27 = arith.select %23, %25, %26 : vector<8x128xi1>, vector<8x128xf32>
      %28 = vector.shape_cast %15 : vector<1x128xf32> to vector<1x128xf32>
      %29 = vector.broadcast %28 : vector<1x128xf32> to vector<8x128xf32>
      %30 = arith.select %21, %29, %27 : vector<8x128xi1>, vector<8x128xf32>
      %c0_18 = arith.constant 0 : index
      %c0_19 = arith.constant 0 : index
      %31 = vector.load %arg6[%c0_18, %c0_19] : memref<8x128xf32, #tpu.memory_space<vmem>>, vector<8x128xf32>
      tpu.vector_store %arg6[%c0_18, %c0_19], %30 {strides = array<i32>} : memref<8x128xf32, #tpu.memory_space<vmem>>, vector<8x128xf32>,
    } else {
    }
    return
  }
  func.func @transform_0(%arg0: i32, %arg1: i32, %arg2: i32) -> (i32, i32) {
    %c0_i32 = arith.constant 0 : i32
    return %arg0, %arg2 : i32, i32
  }
  func.func @transform_1(%arg0: i32, %arg1: i32, %arg2: i32) -> (i32, i32) {
    %c0_i32 = arith.constant 0 : i32
    return %arg2, %arg1 : i32, i32
  }
  func.func @transform_2(%arg0: i32, %arg1: i32, %arg2: i32) -> (i32, i32) {
    %c0_i32 = arith.constant 0 : i32
    return %arg0, %arg1 : i32, i32
  }
  func.func @transform_3(%arg0: i32, %arg1: i32, %arg2: i32) -> (i32, i32) {
    %c0_i32 = arith.constant 0 : i32
    return %arg0, %arg1 : i32, i32
  }
}

</mosaic_0001>

<bundles_post_ra>
// kernel: tpu_custom_call.1
= control target key start
LH: loop header
LB: loop body
LE: loop exit
PB: predicated region body
PF: predicated region fallthrough
CT: control target
= control target key end

     0   :  { %9 = vsyncpa [#allocation4], 0  ;;  %s1842_s0 = inlined_call_operand.hbm [shape: bf16[512,128], index: 0, kind: input, shape index: {}]   ;;  %s1843_s1 = inlined_call_operand.hbm [shape: bf16[128,128], index: 1, kind: input, shape index: {}]   ;;  %s1844_s2 = inlined_call_operand.hbm [shape: f32[512,128], index: 2, kind: output, shape index: {0}]   ;;  %s1845_s3 = inlined_call_operand.hbm [shape: f32[8,128], index: 3, kind: output, shape index: {1}]  }
   0x1   :  { %10 = vsyncpa [#allocation7], 0 }
   0x2   :  { %11 = vsyncpa [#allocation5], 0 }
   0x3   :  { %12 = vsyncpa [#allocation10], 0  ;;  %s17_s14 = sshll.u32 %s1842_s0, 4  ;;  %s1508_s15 = smov [#allocation3]   ;;  %s18_s14 = int_to_ptr.hbm [resolvable:$true] %s17_s14 }
   0x4   :  { %s19_s16 = sshll.u32 %s1508_s15, 4  ;;  %s30_s19 = sshll.u32 %s1843_s1, 4  ;;  %s20_s16 = int_to_ptr.vmem [resolvable:$true] %s19_s16  ;;  %s31_s19 = int_to_ptr.hbm [resolvable:$true] %s30_s19 }
   0x5   :  { %s1509_s20 = smov 64   ;;  %s1510_s21 = smov 4  }
   0x6   :  { %25 = dma.hbm_to_vmem [thread:$0]  %s18_s14, 4096, %s20_s16, [#allocation4], %s1509_s20, %s1509_s20, %s1510_s21  }
   0x7   :  { %s1511_s22 = smov [#allocation6]  }
   0x8   :  { %s32_s23 = sshll.u32 %s1511_s22, 4  ;;  %s33_s23 = int_to_ptr.vmem [resolvable:$true] %s32_s23 }
   0x9   :  { %38 = dma.hbm_to_vmem [thread:$0]  %s31_s19, 1024, %s33_s23, [#allocation7], %s1509_s20, %s1509_s20, %s1510_s21  }
   0xa   :  { %1500 = dma.done.wait [#allocation4], 4096  }
   0xb   :  { %1501 = vsyncadd [#allocation4], 4294963200 }
   0xc   :  { %1502 = dma.done.wait [#allocation7], 1024  }
   0xd   :  { %1503 = vsyncadd [#allocation7], 4294966272  ;;  %v1371_v0 = vld [vmem:[#allocation6 + $0x38] sm:$0xff]  ;;  %v1370_v1 = vld [vmem:[#allocation6 + $0x30] sm:$0xff]  ;;  %s1512_s0 = smov [#allocation8]   ;;  %s1142_s26 = sshll.u32 %s1844_s2, 4  ;;  %s1143_s26 = int_to_ptr.hbm [resolvable:$true] %s1142_s26 }
   0xe   :  { %499 = vmatpush.bf16.msra.mxu0 %v1371_v0  ;;  %1372 = vmatpush.bf16.msra.mxu1 %v1371_v0  ;;  %v1369_v2 = vld [vmem:[#allocation6 + $0x28] sm:$0xff]  ;;  %v1368_v3 = vld [vmem:[#allocation6 + $0x20] sm:$0xff]  ;;  %v1367_v4 = vld [vmem:[#allocation6 + $0x18] sm:$0xff]  ;;  %s1140_s1 = sshll.u32 %s1512_s0, 4  ;;  %s1513_s2 = smov 128   ;;  %s1141_s1 = int_to_ptr.vmem [resolvable:$true] %s1140_s1 }
   0xf   :  { %1373 = vmatpush.bf16.msra.mxu2 %v1371_v0  ;;  %1374 = vmatpush.bf16.msra.mxu3 %v1371_v0  ;;  %v1366_v5 = vld [vmem:[#allocation6 + $0x10] sm:$0xff]  ;;  %v1365_v6 = vld [vmem:[#allocation6 + $0x8] sm:$0xff]  ;;  %v1364_v7 = vld [vmem:[#allocation6] sm:$0xff]  ;;  %s1514_s27 = smov 8   ;;  %s1515_s28 = smov [#allocation9]  }
  0x10   :  { %v1332_v8 = vld [vmem:[#allocation3] sm:$0xff]  ;;  %v1333_v10 = vld [vmem:[#allocation3 + $0x8] sm:$0xff]  ;;  %v1334_v13 = vld [vmem:[#allocation3 + $0x10] sm:$0xff]  ;;  %s1154_s29 = sshll.u32 %s1515_s28, 4  ;;  %s1156_s5 = sshll.u32 %s1845_s3, 4  ;;  %s1155_s29 = int_to_ptr.vmem [resolvable:$true] %s1154_s29  ;;  %s1157_s5 = int_to_ptr.hbm [resolvable:$true] %s1156_s5 }
  0x11   :  { %v1340_v9 = vld [vmem:[#allocation3 + $0x40] sm:$0xff]  ;;  %v1341_v11 = vld [vmem:[#allocation3 + $0x48] sm:$0xff]  ;;  %v1342_v14 = vld [vmem:[#allocation3 + $0x50] sm:$0xff] }
  0x12   :  { %500 = vmatpush.bf16.msra.mxu0 %v1370_v1  ;;  %1375 = vmatpush.bf16.msra.mxu1 %v1370_v1  ;;  %v1348_v12 = vld [vmem:[#allocation3 + $0x80] sm:$0xff]  ;;  %v1349_v15 = vld [vmem:[#allocation3 + $0x88] sm:$0xff]  ;;  %v1335_v16 = vld [vmem:[#allocation3 + $0x18] sm:$0xff] }
  0x13   :  { %1376 = vmatpush.bf16.msra.mxu2 %v1370_v1  ;;  %1377 = vmatpush.bf16.msra.mxu3 %v1370_v1  ;;  %v1343_v17 = vld [vmem:[#allocation3 + $0x58] sm:$0xff]  ;;  %v1350_v18 = vld [vmem:[#allocation3 + $0x90] sm:$0xff]  ;;  %v1356_v19 = vld [vmem:[#allocation3 + $0xc0] sm:$0xff] }
  0x14   :  { %v1336_v20 = vld [vmem:[#allocation3 + $0x20] sm:$0xff]  ;;  %v1351_v22 = vld [vmem:[#allocation3 + $0x98] sm:$0xff]  ;;  %v1357_v23 = vld [vmem:[#allocation3 + $0xc8] sm:$0xff] }
  0x15   :  { %v1344_v21 = vld [vmem:[#allocation3 + $0x60] sm:$0xff]  ;;  %v1337_v24 = vld [vmem:[#allocation3 + $0x28] sm:$0xff]  ;;  %v1358_v27 = vld [vmem:[#allocation3 + $0xd0] sm:$0xff] }
  0x16   :  { %501 = vmatpush.bf16.msra.mxu0 %v1369_v2  ;;  %1378 = vmatpush.bf16.msra.mxu1 %v1369_v2  ;;  %v1345_v25 = vld [vmem:[#allocation3 + $0x68] sm:$0xff]  ;;  %v1352_v26 = vld [vmem:[#allocation3 + $0xa0] sm:$0xff]  ;;  %v1338_v28 = vld [vmem:[#allocation3 + $0x30] sm:$0xff] }
  0x17   :  { %1379 = vmatpush.bf16.msra.mxu2 %v1369_v2  ;;  %1380 = vmatpush.bf16.msra.mxu3 %v1369_v2  ;;  %v1346_v29 = vld [vmem:[#allocation3 + $0x70] sm:$0xff]  ;;  %v1353_v30 = vld [vmem:[#allocation3 + $0xa8] sm:$0xff]  ;;  %v1359_v31 = vld [vmem:[#allocation3 + $0xd8] sm:$0xff] }
  0x18   :  { %v1339_v32 = vld [vmem:[#allocation3 + $0x38] sm:$0xff]  ;;  %v1354_v34 = vld [vmem:[#allocation3 + $0xb0] sm:$0xff]  ;;  %v1360_v35 = vld [vmem:[#allocation3 + $0xe0] sm:$0xff] }
  0x19   :  { %v1347_v33 = vld [vmem:[#allocation3 + $0x78] sm:$0xff]  ;;  %v1361_v39 = vld [vmem:[#allocation3 + $0xe8] sm:$0xff]  ;;  %v1362_v51 = vld [vmem:[#allocation3 + $0xf0] sm:$0xff] }
  0x1a   :  { %502 = vmatpush.bf16.msra.mxu0 %v1368_v3  ;;  %1381 = vmatpush.bf16.msra.mxu1 %v1368_v3  ;;  %v1355_v38 = vld [vmem:[#allocation3 + $0xb8] sm:$0xff] }
  0x1b   :  { %1382 = vmatpush.bf16.msra.mxu2 %v1368_v3  ;;  %1383 = vmatpush.bf16.msra.mxu3 %v1368_v3  ;;  %v1363_v0 = vld [vmem:[#allocation3 + $0xf8] sm:$0xff] }
  0x1e   :  { %503 = vmatpush.bf16.msra.mxu0 %v1367_v4  ;;  %1384 = vmatpush.bf16.msra.mxu1 %v1367_v4 }
  0x1f   :  { %1385 = vmatpush.bf16.msra.mxu2 %v1367_v4  ;;  %1386 = vmatpush.bf16.msra.mxu3 %v1367_v4 }
  0x22   :  { %504 = vmatpush.bf16.msra.mxu0 %v1366_v5  ;;  %1387 = vmatpush.bf16.msra.mxu1 %v1366_v5 }
  0x23   :  { %1388 = vmatpush.bf16.msra.mxu2 %v1366_v5  ;;  %1389 = vmatpush.bf16.msra.mxu3 %v1366_v5 }
  0x26   :  { %505 = vmatpush.bf16.msra.mxu0 %v1365_v6  ;;  %1390 = vmatpush.bf16.msra.mxu1 %v1365_v6 }
  0x27   :  { %1391 = vmatpush.bf16.msra.mxu2 %v1365_v6  ;;  %1392 = vmatpush.bf16.msra.mxu3 %v1365_v6 }
  0x2a   :  { %506 = vmatpush.bf16.msra.mxu0 %v1364_v7  ;;  %1393 = vmatpush.bf16.msra.mxu1 %v1364_v7 }
  0x2b   :  { %1394 = vmatpush.bf16.msra.mxu2 %v1364_v7  ;;  %1395 = vmatpush.bf16.msra.mxu3 %v1364_v7 }
  0x2d   :  { %507 = vmatmul.bf16.vlgmr.msra.gmra.mxu0 %v1332_v8  ;;  %547 = vmatmul.bf16.vlgmr.msra.gmra.mxu1 %v1340_v9 }
  0x2e   :  { %587 = vmatmul.bf16.vlgmr.msra.gmra.mxu2 %v1348_v12  ;;  %627 = vmatmul.bf16.vlgmr.msra.gmra.mxu3 %v1356_v19 }
  0x3d   :  { %512 = vmatmul.bf16.gmra.mxu0 %v1333_v10  ;;  %552 = vmatmul.bf16.gmra.mxu1 %v1341_v11 }
  0x3e   :  { %592 = vmatmul.bf16.gmra.mxu2 %v1349_v15  ;;  %632 = vmatmul.bf16.gmra.mxu3 %v1357_v23 }
  0x4d   :  { %517 = vmatmul.bf16.gmra.mxu0 %v1334_v13  ;;  %557 = vmatmul.bf16.gmra.mxu1 %v1342_v14 }
  0x4e   :  { %597 = vmatmul.bf16.gmra.mxu2 %v1350_v18  ;;  %637 = vmatmul.bf16.gmra.mxu3 %v1358_v27 }
  0x5d   :  { %522 = vmatmul.bf16.gmra.mxu0 %v1335_v16  ;;  %562 = vmatmul.bf16.gmra.mxu1 %v1343_v17 }
  0x5e   :  { %602 = vmatmul.bf16.gmra.mxu2 %v1351_v22  ;;  %642 = vmatmul.bf16.gmra.mxu3 %v1359_v31 }
  0x6d   :  { %527 = vmatmul.bf16.gmra.mxu0 %v1336_v20  ;;  %567 = vmatmul.bf16.gmra.mxu1 %v1344_v21 }
  0x6e   :  { %607 = vmatmul.bf16.gmra.mxu2 %v1352_v26  ;;  %647 = vmatmul.bf16.gmra.mxu3 %v1360_v35 }
  0x7d   :  { %532 = vmatmul.bf16.gmra.mxu0 %v1337_v24  ;;  %572 = vmatmul.bf16.gmra.mxu1 %v1345_v25 }
  0x7e   :  { %612 = vmatmul.bf16.gmra.mxu2 %v1353_v30  ;;  %652 = vmatmul.bf16.gmra.mxu3 %v1361_v39 }
  0x8d   :  { %537 = vmatmul.bf16.gmra.mxu0 %v1338_v28  ;;  %577 = vmatmul.bf16.gmra.mxu1 %v1346_v29 }
  0x8e   :  { %617 = vmatmul.bf16.gmra.mxu2 %v1354_v34  ;;  %657 = vmatmul.bf16.gmra.mxu3 %v1362_v51 }
  0x9d   :  { %542 = vmatmul.bf16.gmra.mxu0 %v1339_v32  ;;  %582 = vmatmul.bf16.gmra.mxu1 %v1347_v33 }
  0x9e   :  { %622 = vmatmul.bf16.gmra.mxu2 %v1355_v38  ;;  %662 = vmatmul.bf16.gmra.mxu3 %v1363_v0 }
  0xaa   :  { %v508_v36 = vpop.f32.mrf.mxu0  ;;  %v1542_v37 = vpop.f32.mrf.mxu1 }
  0xab   :  { %863 = vst [vmem:[#allocation8] sm:$0xff] %v508_v36  ;;  %v996_v42 = vmul.f32 %v508_v36, %v508_v36 }
  0xac   :  { %879 = vst [vmem:[#allocation8 + $0x80] sm:$0xff] %v1542_v37 }
  0xb1   :  { %v1553_v56 = vpop.f32.mrf.mxu2  ;;  %v1583_v10 = vpop.f32.mrf.mxu3 }
  0xb2   :  { %v510_v40 = vpop.f32.mrf.mxu0  ;;  %v1545_v41 = vpop.f32.mrf.mxu1  ;;  %895 = vst [vmem:[#allocation8 + $0x100] sm:$0xff] %v1553_v56 }
  0xb3   :  { %864 = vst [vmem:[#allocation8 + $0x8] sm:$0xff] %v510_v40  ;;  %v927_v43 = vadd.f32 %v510_v40, %v508_v36  ;;  %v997_v44 = vmul.f32 %v510_v40, %v510_v40 }
  0xb4   :  { %880 = vst [vmem:[#allocation8 + $0x88] sm:$0xff] %v1545_v41 }
  0xb5   :  { %v1060_v45 = vadd.f32 %v997_v44, %v996_v42  ;;  %911 = vst [vmem:[#allocation8 + $0x180] sm:$0xff] %v1583_v10 }
  0xb9   :  { %v1561_v62 = vpop.f32.mrf.mxu2  ;;  %v1592_v14 = vpop.f32.mrf.mxu3 }
  0xba   :  { %v513_v46 = vpop.f32.mrf.mxu0  ;;  %v1548_v47 = vpop.f32.mrf.mxu1  ;;  %896 = vst [vmem:[#allocation8 + $0x108] sm:$0xff] %v1561_v62 }
  0xbb   :  { %865 = vst [vmem:[#allocation8 + $0x10] sm:$0xff] %v513_v46  ;;  %v928_v48 = vadd.f32 %v927_v43, %v513_v46  ;;  %v998_v49 = vmul.f32 %v513_v46, %v513_v46 }
  0xbc   :  { %881 = vst [vmem:[#allocation8 + $0x90] sm:$0xff] %v1548_v47 }
  0xbd   :  { %v1061_v50 = vadd.f32 %v1060_v45, %v998_v49  ;;  %912 = vst [vmem:[#allocation8 + $0x188] sm:$0xff] %v1592_v14 }
  0xc1   :  { %v1569_v3 = vpop.f32.mrf.mxu2  ;;  %v1601_v18 = vpop.f32.mrf.mxu3 }
  0xc2   :  { %v515_v52 = vpop.f32.mrf.mxu0  ;;  %v1551_v53 = vpop.f32.mrf.mxu1  ;;  %897 = vst [vmem:[#allocation8 + $0x110] sm:$0xff] %v1569_v3 }
  0xc3   :  { %866 = vst [vmem:[#allocation8 + $0x18] sm:$0xff] %v515_v52  ;;  %v929_v54 = vadd.f32 %v928_v48, %v515_v52  ;;  %v999_v55 = vmul.f32 %v515_v52, %v515_v52 }
  0xc4   :  { %882 = vst [vmem:[#allocation8 + $0x98] sm:$0xff] %v1551_v53 }
  0xc5   :  { %v1062_v57 = vadd.f32 %v1061_v50, %v999_v55  ;;  %913 = vst [vmem:[#allocation8 + $0x190] sm:$0xff] %v1601_v18 }
  0xc9   :  { %v1575_v6 = vpop.f32.mrf.mxu2  ;;  %v1610_v22 = vpop.f32.mrf.mxu3 }
  0xca   :  { %v518_v58 = vpop.f32.mrf.mxu0  ;;  %v1557_v59 = vpop.f32.mrf.mxu1  ;;  %898 = vst [vmem:[#allocation8 + $0x118] sm:$0xff] %v1575_v6 }
  0xcb   :  { %867 = vst [vmem:[#allocation8 + $0x20] sm:$0xff] %v518_v58  ;;  %v1559_v60 = vadd.f32 %v929_v54, %v518_v58  ;;  %v1000_v61 = vmul.f32 %v518_v58, %v518_v58 }
  0xcc   :  { %883 = vst [vmem:[#allocation8 + $0xa0] sm:$0xff] %v1557_v59 }
  0xcd   :  { %v1564_v63 = vadd.f32 %v1062_v57, %v1000_v61  ;;  %914 = vst [vmem:[#allocation8 + $0x198] sm:$0xff] %v1610_v22 }
  0xd1   :  { %v1581_v9 = vpop.f32.mrf.mxu2  ;;  %v1619_v26 = vpop.f32.mrf.mxu3 }
  0xd2   :  { %v520_v1 = vpop.f32.mrf.mxu0  ;;  %v1567_v2 = vpop.f32.mrf.mxu1  ;;  %899 = vst [vmem:[#allocation8 + $0x120] sm:$0xff] %v1581_v9 }
  0xd3   :  { %868 = vst [vmem:[#allocation8 + $0x28] sm:$0xff] %v520_v1  ;;  %v1001_v31 = vmul.f32 %v520_v1, %v520_v1  ;;  %v931_v32 = vadd.f32 %v1559_v60, %v520_v1 }
  0xd4   :  { %884 = vst [vmem:[#allocation8 + $0xa8] sm:$0xff] %v1567_v2 }
  0xd5   :  { %915 = vst [vmem:[#allocation8 + $0x1a0] sm:$0xff] %v1619_v26  ;;  %v1064_v34 = vadd.f32 %v1564_v63, %v1001_v31 }
  0xd9   :  { %v1590_v13 = vpop.f32.mrf.mxu2  ;;  %v1628_v30 = vpop.f32.mrf.mxu3 }
  0xda   :  { %v523_v4 = vpop.f32.mrf.mxu0  ;;  %v1573_v5 = vpop.f32.mrf.mxu1  ;;  %900 = vst [vmem:[#allocation8 + $0x128] sm:$0xff] %v1590_v13 }
  0xdb   :  { %869 = vst [vmem:[#allocation8 + $0x30] sm:$0xff] %v523_v4  ;;  %v1002_v33 = vmul.f32 %v523_v4, %v523_v4  ;;  %v932_v35 = vadd.f32 %v931_v32, %v523_v4 }
  0xdc   :  { %885 = vst [vmem:[#allocation8 + $0xb0] sm:$0xff] %v1573_v5 }
  0xdd   :  { %916 = vst [vmem:[#allocation8 + $0x1a8] sm:$0xff] %v1628_v30  ;;  %v1065_v40 = vadd.f32 %v1064_v34, %v1002_v33 }
  0xe1   :  { %v1599_v17 = vpop.f32.mrf.mxu2  ;;  %v1639_v45 = vpop.f32.mrf.mxu3 }
  0xe2   :  { %v525_v7 = vpop.f32.mrf.mxu0  ;;  %v1579_v8 = vpop.f32.mrf.mxu1  ;;  %901 = vst [vmem:[#allocation8 + $0x130] sm:$0xff] %v1599_v17 }
  0xe3   :  { %870 = vst [vmem:[#allocation8 + $0x38] sm:$0xff] %v525_v7  ;;  %v1003_v36 = vmul.f32 %v525_v7, %v525_v7  ;;  %v933_v42 = vadd.f32 %v932_v35, %v525_v7 }
  0xe4   :  { %886 = vst [vmem:[#allocation8 + $0xb8] sm:$0xff] %v1579_v8 }
  0xe5   :  { %v1066_v46 = vadd.f32 %v1065_v40, %v1003_v36  ;;  %917 = vst [vmem:[#allocation8 + $0x1b0] sm:$0xff] %v1639_v45 }
  0xe9   :  { %v1608_v21 = vpop.f32.mrf.mxu2  ;;  %v1648_v4 = vpop.f32.mrf.mxu3 }
  0xea   :  { %v528_v11 = vpop.f32.mrf.mxu0  ;;  %v1588_v12 = vpop.f32.mrf.mxu1  ;;  %902 = vst [vmem:[#allocation8 + $0x138] sm:$0xff] %v1608_v21 }
  0xeb   :  { %871 = vst [vmem:[#allocation8 + $0x40] sm:$0xff] %v528_v11  ;;  %v1004_v43 = vmul.f32 %v528_v11, %v528_v11  ;;  %v934_v48 = vadd.f32 %v933_v42, %v528_v11 }
  0xec   :  { %887 = vst [vmem:[#allocation8 + $0xc0] sm:$0xff] %v1588_v12 }
  0xed   :  { %v1067_v50 = vadd.f32 %v1066_v46, %v1004_v43  ;;  %918 = vst [vmem:[#allocation8 + $0x1b8] sm:$0xff] %v1648_v4  ;;  %v1012_v46 = vmul.f32 %v1542_v37, %v1542_v37 }
  0xf1   :  { %v1617_v25 = vpop.f32.mrf.mxu2 }
  0xf2   :  { %v530_v15 = vpop.f32.mrf.mxu0  ;;  %v1597_v16 = vpop.f32.mrf.mxu1  ;;  %903 = vst [vmem:[#allocation8 + $0x140] sm:$0xff] %v1617_v25 }
  0xf3   :  { %872 = vst [vmem:[#allocation8 + $0x48] sm:$0xff] %v530_v15  ;;  %v1005_v49 = vmul.f32 %v530_v15, %v530_v15  ;;  %v935_v51 = vadd.f32 %v934_v48, %v530_v15 }
  0xf4   :  { %888 = vst [vmem:[#allocation8 + $0xc8] sm:$0xff] %v1597_v16 }
  0xf5   :  { %v1068_v54 = vadd.f32 %v1067_v50, %v1005_v49  ;;  %v1013_v49 = vmul.f32 %v1545_v41, %v1545_v41 }
  0xf9   :  { %v1626_v29 = vpop.f32.mrf.mxu2 }
  0xfa   :  { %v533_v19 = vpop.f32.mrf.mxu0  ;;  %v1606_v20 = vpop.f32.mrf.mxu1  ;;  %904 = vst [vmem:[#allocation8 + $0x148] sm:$0xff] %v1626_v29 }
  0xfb   :  { %873 = vst [vmem:[#allocation8 + $0x50] sm:$0xff] %v533_v19  ;;  %v1006_v52 = vmul.f32 %v533_v19, %v533_v19  ;;  %v936_v55 = vadd.f32 %v935_v51, %v533_v19 }
  0xfc   :  { %889 = vst [vmem:[#allocation8 + $0xd0] sm:$0xff] %v1606_v20 }
  0xfd   :  { %v1069_v61 = vadd.f32 %v1068_v54, %v1006_v52  ;;  %v1014_v52 = vmul.f32 %v1548_v47, %v1548_v47 }
 0x101   :  { %v1637_v44 = vpop.f32.mrf.mxu2 }
 0x102   :  { %v535_v23 = vpop.f32.mrf.mxu0  ;;  %v1615_v24 = vpop.f32.mrf.mxu1  ;;  %905 = vst [vmem:[#allocation8 + $0x150] sm:$0xff] %v1637_v44 }
 0x103   :  { %874 = vst [vmem:[#allocation8 + $0x58] sm:$0xff] %v535_v23  ;;  %v1007_v57 = vmul.f32 %v535_v23, %v535_v23  ;;  %v937_v63 = vadd.f32 %v936_v55, %v535_v23 }
 0x104   :  { %890 = vst [vmem:[#allocation8 + $0xd8] sm:$0xff] %v1615_v24 }
 0x105   :  { %v1070_v7 = vadd.f32 %v1069_v61, %v1007_v57 }
 0x109   :  { %v1646_v1 = vpop.f32.mrf.mxu2 }
 0x10a   :  { %v538_v27 = vpop.f32.mrf.mxu0  ;;  %v1624_v28 = vpop.f32.mrf.mxu1  ;;  %906 = vst [vmem:[#allocation8 + $0x158] sm:$0xff] %v1646_v1 }
 0x10b   :  { %875 = vst [vmem:[#allocation8 + $0x60] sm:$0xff] %v538_v27  ;;  %v1008_v0 = vmul.f32 %v538_v27, %v538_v27  ;;  %v938_v11 = vadd.f32 %v937_v63, %v538_v27  ;;  %v1657_v27 = vpop.f32.mrf.mxu3 }
 0x10c   :  { %891 = vst [vmem:[#allocation8 + $0xe0] sm:$0xff] %v1624_v28 }
 0x10d   :  { %v1071_v19 = vadd.f32 %v1070_v7, %v1008_v0  ;;  %919 = vst [vmem:[#allocation8 + $0x1c0] sm:$0xff] %v1657_v27 }
 0x111   :  { %v1655_v43 = vpop.f32.mrf.mxu2 }
 0x112   :  { %v540_v38 = vpop.f32.mrf.mxu0  ;;  %v1635_v39 = vpop.f32.mrf.mxu1  ;;  %907 = vst [vmem:[#allocation8 + $0x160] sm:$0xff] %v1655_v43 }
 0x113   :  { %876 = vst [vmem:[#allocation8 + $0x68] sm:$0xff] %v540_v38  ;;  %v1009_v15 = vmul.f32 %v540_v38, %v540_v38  ;;  %v939_v31 = vadd.f32 %v938_v11, %v540_v38  ;;  %v1676_v63 = vpop.f32.mrf.mxu3 }
 0x114   :  { %892 = vst [vmem:[#allocation8 + $0xe8] sm:$0xff] %v1635_v39 }
 0x115   :  { %v1072_v33 = vadd.f32 %v1071_v19, %v1009_v15  ;;  %920 = vst [vmem:[#allocation8 + $0x1c8] sm:$0xff] %v1676_v63  ;;  %v1018_v15 = vmul.f32 %v1573_v5, %v1573_v5 }
 0x119   :  { %v1674_v61 = vpop.f32.mrf.mxu2 }
 0x11a   :  { %v543_v58 = vpop.f32.mrf.mxu0  ;;  %v1644_v60 = vpop.f32.mrf.mxu1  ;;  %908 = vst [vmem:[#allocation8 + $0x168] sm:$0xff] %v1674_v61 }
 0x11b   :  { %877 = vst [vmem:[#allocation8 + $0x70] sm:$0xff] %v543_v58  ;;  %v1010_v32 = vmul.f32 %v543_v58, %v543_v58  ;;  %v940_v23 = vadd.f32 %v939_v31, %v543_v58 }
 0x11c   :  { %893 = vst [vmem:[#allocation8 + $0xf0] sm:$0xff] %v1644_v60 }
 0x11d   :  { %v1073_v36 = vadd.f32 %v1072_v33, %v1010_v32  ;;  %v1019_v32 = vmul.f32 %v1579_v8, %v1579_v8 }
 0x122   :  { %v545_v34 = vpop.f32.mrf.mxu0  ;;  %v1653_v35 = vpop.f32.mrf.mxu1 }
 0x123   :  { %878 = vst [vmem:[#allocation8 + $0x78] sm:$0xff] %v545_v34  ;;  %v941_v40 = vadd.f32 %v940_v23, %v545_v34  ;;  %v1011_v42 = vmul.f32 %v545_v34, %v545_v34  ;;  %v1692_v23 = vpop.f32.mrf.mxu2  ;;  %v1694_v34 = vpop.f32.mrf.mxu3 }
 0x124   :  { %894 = vst [vmem:[#allocation8 + $0xf8] sm:$0xff] %v1653_v35 }
 0x125   :  { %v942_v38 = vadd.f32 %v941_v40, %v1542_v37  ;;  %v1074_v48 = vadd.f32 %v1073_v36, %v1011_v42  ;;  %v1015_v37 = vmul.f32 %v1551_v53, %v1551_v53  ;;  %909 = vst [vmem:[#allocation8 + $0x170] sm:$0xff] %v1692_v23 }
 0x126   :  { %921 = vst [vmem:[#allocation8 + $0x1d0] sm:$0xff] %v1694_v34 }
 0x127   :  { %v943_v50 = vadd.f32 %v942_v38, %v1545_v41  ;;  %v1075_v51 = vadd.f32 %v1074_v48, %v1012_v46  ;;  %v1016_v41 = vmul.f32 %v1557_v59, %v1557_v59  ;;  %v1022_v46 = vmul.f32 %v1606_v20, %v1606_v20 }
 0x129   :  { %v944_v54 = vadd.f32 %v943_v50, %v1548_v47  ;;  %v1076_v55 = vadd.f32 %v1075_v51, %v1013_v49  ;;  %v1017_v47 = vmul.f32 %v1567_v2, %v1567_v2  ;;  %v1023_v49 = vmul.f32 %v1615_v24, %v1615_v24 }
 0x12b   :  { %v945_v57 = vadd.f32 %v944_v54, %v1551_v53  ;;  %v1077_v58 = vadd.f32 %v1076_v55, %v1014_v52  ;;  %v1710_v51 = vpop.f32.mrf.mxu2  ;;  %v1712_v52 = vpop.f32.mrf.mxu3  ;;  %v1024_v54 = vmul.f32 %v1624_v28, %v1624_v28 }
 0x12c   :  { %910 = vst [vmem:[#allocation8 + $0x178] sm:$0xff] %v1710_v51 }
 0x12d   :  { %v946_v0 = vadd.f32 %v945_v57, %v1557_v59  ;;  %v1078_v7 = vadd.f32 %v1077_v58, %v1015_v37  ;;  %922 = vst [vmem:[#allocation8 + $0x1d8] sm:$0xff] %v1712_v52 }
 0x12f   :  { %v947_v53 = vadd.f32 %v946_v0, %v1567_v2  ;;  %v1079_v11 = vadd.f32 %v1078_v7, %v1016_v41  ;;  %v1020_v2 = vmul.f32 %v1588_v12, %v1588_v12  ;;  %v1026_v41 = vmul.f32 %v1644_v60, %v1644_v60 }
 0x131   :  { %v1080_v19 = vadd.f32 %v1079_v11, %v1017_v47  ;;  %v948_v31 = vadd.f32 %v947_v53, %v1573_v5  ;;  %v1021_v5 = vmul.f32 %v1597_v16, %v1597_v16  ;;  %v1028_v53 = vmul.f32 %v1553_v56, %v1553_v56 }
 0x133   :  { %v949_v59 = vadd.f32 %v948_v31, %v1579_v8  ;;  %v1081_v33 = vadd.f32 %v1080_v19, %v1018_v15  ;;  %v1728_v47 = vpop.f32.mrf.mxu3  ;;  %v1029_v15 = vmul.f32 %v1561_v62, %v1561_v62  ;;  %v1030_v31 = vmul.f32 %v1569_v3, %v1569_v3 }
 0x134   :  { %923 = vst [vmem:[#allocation8 + $0x1e0] sm:$0xff] %v1728_v47 }
 0x135   :  { %v950_v36 = vadd.f32 %v949_v59, %v1588_v12  ;;  %v1082_v40 = vadd.f32 %v1081_v33, %v1019_v32  ;;  %v1031_v59 = vmul.f32 %v1575_v6, %v1575_v6 }
 0x137   :  { %v951_v8 = vadd.f32 %v950_v36, %v1597_v16  ;;  %v1083_v42 = vadd.f32 %v1082_v40, %v1020_v2 }
 0x139   :  { %v952_v38 = vadd.f32 %v951_v8, %v1606_v20  ;;  %v1084_v48 = vadd.f32 %v1083_v42, %v1021_v5 }
 0x13b   :  { %v953_v12 = vadd.f32 %v952_v38, %v1615_v24  ;;  %v1085_v50 = vadd.f32 %v1084_v48, %v1022_v46  ;;  %v1025_v24 = vmul.f32 %v1635_v39, %v1635_v39  ;;  %v1035_v38 = vmul.f32 %v1608_v21, %v1608_v21 }
 0x13d   :  { %v954_v16 = vadd.f32 %v953_v12, %v1624_v28  ;;  %v1086_v55 = vadd.f32 %v1085_v50, %v1023_v49  ;;  %v1027_v28 = vmul.f32 %v1653_v35, %v1653_v35 }
 0x13f   :  { %v1087_v20 = vadd.f32 %v1086_v55, %v1024_v54  ;;  %v955_v37 = vadd.f32 %v954_v16, %v1635_v39  ;;  %v1038_v54 = vmul.f32 %v1637_v44, %v1637_v44 }
 0x141   :  { %v1088_v57 = vadd.f32 %v1087_v20, %v1025_v24  ;;  %v956_v58 = vadd.f32 %v955_v37, %v1644_v60  ;;  %v1039_v37 = vmul.f32 %v1646_v1, %v1646_v1 }
 0x143   :  { %v1089_v0 = vadd.f32 %v1088_v57, %v1026_v41  ;;  %v957_v7 = vadd.f32 %v956_v58, %v1653_v35  ;;  %v1040_v41 = vmul.f32 %v1655_v43, %v1655_v43 }
 0x145   :  { %v958_v39 = vadd.f32 %v957_v7, %v1553_v56  ;;  %v1090_v11 = vadd.f32 %v1089_v0, %v1027_v28  ;;  %v1743_v56 = vpop.f32.mrf.mxu3 }
 0x146   :  { %924 = vst [vmem:[#allocation8 + $0x1e8] sm:$0xff] %v1743_v56 }
 0x147   :  { %v959_v60 = vadd.f32 %v958_v39, %v1561_v62  ;;  %v1091_v19 = vadd.f32 %v1090_v11, %v1028_v53  ;;  %v1032_v62 = vmul.f32 %v1581_v9, %v1581_v9  ;;  %v1042_v53 = vmul.f32 %v1692_v23, %v1692_v23 }
 0x149   :  { %v960_v35 = vadd.f32 %v959_v60, %v1569_v3  ;;  %v1092_v32 = vadd.f32 %v1091_v19, %v1029_v15  ;;  %v1033_v3 = vmul.f32 %v1590_v13, %v1590_v13  ;;  %v1044_v15 = vmul.f32 %v1583_v10, %v1583_v10 }
 0x14b   :  { %v961_v33 = vadd.f32 %v960_v35, %v1575_v6  ;;  %v1093_v2 = vadd.f32 %v1092_v32, %v1030_v31  ;;  %v1034_v6 = vmul.f32 %v1599_v17, %v1599_v17 }
 0x14d   :  { %v962_v36 = vadd.f32 %v961_v33, %v1581_v9  ;;  %v1094_v40 = vadd.f32 %v1093_v2, %v1031_v59  ;;  %v1758_v9 = vpop.f32.mrf.mxu3 }
 0x14e   :  { %925 = vst [vmem:[#allocation8 + $0x1f0] sm:$0xff] %v1758_v9 }
 0x14f   :  { %v963_v5 = vadd.f32 %v962_v36, %v1590_v13  ;;  %v1095_v8 = vadd.f32 %v1094_v40, %v1032_v62  ;;  %v1036_v13 = vmul.f32 %v1617_v25, %v1617_v25 }
 0x151   :  { %v1096_v42 = vadd.f32 %v1095_v8, %v1033_v3  ;;  %v964_v46 = vadd.f32 %v963_v5, %v1599_v17  ;;  %v1037_v17 = vmul.f32 %v1626_v29, %v1626_v29 }
 0x153   :  { %v965_v48 = vadd.f32 %v964_v46, %v1608_v21  ;;  %v1097_v49 = vadd.f32 %v1096_v42, %v1034_v6 }
 0x155   :  { %v966_v12 = vadd.f32 %v965_v48, %v1617_v25  ;;  %v1098_v50 = vadd.f32 %v1097_v49, %v1035_v38  ;;  %v1776_v57 = vpop.f32.mrf.mxu3 }
 0x156   :  { %926 = vst [vmem:[#allocation8 + $0x1f8] sm:$0xff] %v1776_v57 }
 0x157   :  { %v967_v21 = vadd.f32 %v966_v12, %v1626_v29  ;;  %v1099_v16 = vadd.f32 %v1098_v50, %v1036_v13  ;;  %1148 = dma.vmem_to_hbm [thread:$0]  %s1141_s1, 8192, %s1143_s26, [#allocation5], %s1513_s2, %s1513_s2, %s1514_s27   ;;  %v1055_v50 = vmul.f32 %v1712_v52, %v1712_v52 }
 0x159   :  { %v968_v55 = vadd.f32 %v967_v21, %v1637_v44  ;;  %v1100_v20 = vadd.f32 %v1099_v16, %v1037_v17  ;;  %v1056_v16 = vmul.f32 %v1728_v47, %v1728_v47 }
 0x15b   :  { %v969_v25 = vadd.f32 %v968_v55, %v1646_v1  ;;  %v1101_v24 = vadd.f32 %v1100_v20, %v1038_v54  ;;  %v1041_v1 = vmul.f32 %v1674_v61, %v1674_v61  ;;  %v1057_v55 = vmul.f32 %v1743_v56, %v1743_v56 }
 0x15d   :  { %v1102_v29 = vadd.f32 %v1101_v24, %v1039_v37  ;;  %v970_v58 = vadd.f32 %v969_v25, %v1655_v43  ;;  %v1043_v43 = vmul.f32 %v1710_v51, %v1710_v51  ;;  %v1058_v25 = vmul.f32 %v1758_v9, %v1758_v9 }
 0x15e   :  { %v1059_v24 = vmul.f32 %v1776_v57, %v1776_v57 }
 0x15f   :  { %v1103_v44 = vadd.f32 %v1102_v29, %v1040_v41  ;;  %v971_v0 = vadd.f32 %v970_v58, %v1674_v61  ;;  %v1045_v61 = vmul.f32 %v1592_v14, %v1592_v14 }
 0x161   :  { %v1104_v7 = vadd.f32 %v1103_v44, %v1041_v1  ;;  %v972_v28 = vadd.f32 %v971_v0, %v1692_v23  ;;  %v1046_v23 = vmul.f32 %v1601_v18, %v1601_v18  ;;  %v1129_v44 = vlaneseq }
 0x163   :  { %v1105_v39 = vadd.f32 %v1104_v7, %v1042_v53  ;;  %v973_v11 = vadd.f32 %v972_v28, %v1710_v51  ;;  %v1047_v51 = vmul.f32 %v1610_v22, %v1610_v22  ;;  %v1130_v28 = vshrl.u32 %v1129_v44, 7 }
 0x165   :  { %v974_v60 = vadd.f32 %v973_v11, %v1583_v10  ;;  %v1106_v19 = vadd.f32 %v1105_v39, %v1043_v43  ;;  %v1048_v10 = vmul.f32 %v1619_v26, %v1619_v26  ;;  %vm1132_vm0 = vcmp.eq.s32.totalorder %v1130_v28, 1 }
 0x166   :  { %vm1131_vm1 = vcmp.eq.s32.totalorder %v1130_v28, 0 }
 0x167   :  { %v975_v31 = vadd.f32 %v974_v60, %v1592_v14  ;;  %v1107_v35 = vadd.f32 %v1106_v19, %v1044_v15  ;;  %v1049_v14 = vmul.f32 %v1628_v30, %v1628_v30 }
 0x169   :  { %v976_v32 = vadd.f32 %v975_v31, %v1601_v18  ;;  %v1108_v59 = vadd.f32 %v1107_v35, %v1045_v61  ;;  %v1050_v18 = vmul.f32 %v1639_v45, %v1639_v45 }
 0x16b   :  { %v977_v33 = vadd.f32 %v976_v32, %v1610_v22  ;;  %v1109_v2 = vadd.f32 %v1108_v59, %v1046_v23  ;;  %v1051_v22 = vmul.f32 %v1648_v4, %v1648_v4 }
 0x16d   :  { %v978_v62 = vadd.f32 %v977_v33, %v1619_v26  ;;  %v1110_v36 = vadd.f32 %v1109_v2, %v1047_v51  ;;  %v1052_v26 = vmul.f32 %v1657_v27, %v1657_v27 }
 0x16f   :  { %v979_v40 = vadd.f32 %v978_v62, %v1628_v30  ;;  %v1111_v3 = vadd.f32 %v1110_v36, %v1048_v10  ;;  %v1053_v30 = vmul.f32 %v1676_v63, %v1676_v63 }
 0x171   :  { %v1112_v5 = vadd.f32 %v1111_v3, %v1049_v14  ;;  %v980_v8 = vadd.f32 %v979_v40, %v1639_v45  ;;  %v1054_v45 = vmul.f32 %v1694_v34, %v1694_v34 }
 0x173   :  { %v981_v6 = vadd.f32 %v980_v8, %v1648_v4  ;;  %v1113_v42 = vadd.f32 %v1112_v5, %v1050_v18 }
 0x175   :  { %v982_v46 = vadd.f32 %v981_v6, %v1657_v27  ;;  %v1114_v38 = vadd.f32 %v1113_v42, %v1051_v22 }
 0x177   :  { %v983_v48 = vadd.f32 %v982_v46, %v1676_v63  ;;  %v1115_v49 = vadd.f32 %v1114_v38, %v1052_v26 }
 0x179   :  { %v984_v13 = vadd.f32 %v983_v48, %v1694_v34  ;;  %v1116_v12 = vadd.f32 %v1115_v49, %v1053_v30 }
 0x17b   :  { %v985_v4 = vadd.f32 %v984_v13, %v1712_v52  ;;  %v1117_v17 = vadd.f32 %v1116_v12, %v1054_v45 }
 0x17d   :  { %v1118_v27 = vadd.f32 %v1117_v17, %v1055_v50  ;;  %v986_v21 = vadd.f32 %v985_v4, %v1728_v47 }
 0x17f   :  { %v1119_v63 = vadd.f32 %v1118_v27, %v1056_v16  ;;  %v987_v54 = vadd.f32 %v986_v21, %v1743_v56 }
 0x181   :  { %v1120_v34 = vadd.f32 %v1119_v63, %v1057_v55  ;;  %v988_v20 = vadd.f32 %v987_v54, %v1758_v9 }
 0x183   :  { %v1121_v52 = vadd.f32 %v1120_v34, %v1058_v25  ;;  %v989_v37 = vadd.f32 %v988_v20, %v1776_v57 }
 0x185   :  { %v990_v29 = vrot.slane %v989_v37, 4  ;;  %v1122_v47 = vadd.f32 %v1121_v52, %v1059_v24 }
 0x187   :  { %v991_v58 = vadd.f32 %v990_v29, %v989_v37  ;;  %v1123_v41 = vrot.slane %v1122_v47, 4 }
 0x189   :  { %v992_v0 = vrot.slane %v991_v58, 2  ;;  %v1124_v1 = vadd.f32 %v1123_v41, %v1122_v47 }
 0x18b   :  { %v993_v56 = vadd.f32 %v992_v0, %v991_v58  ;;  %v1125_v7 = vrot.slane %v1124_v1, 2 }
 0x18d   :  { %v1126_v53 = vadd.f32 %v1125_v7, %v1124_v1  ;;  %v994_v39 = vrot.slane %v993_v56, 1 }
 0x18f   :  { %v1127_v11 = vrot.slane %v1126_v53, 1  ;;  %v995_v57 = vadd.f32 %v994_v39, %v993_v56 }
 0x191   :  { %v1128_v9 = vadd.f32 %v1127_v11, %v1126_v53 }
 0x193   :  { %v1133_v43 = vsel %vm1132_vm0, %v1128_v9, 0.0 }
 0x194   :  { %v1134_v15 = vsel %vm1131_vm1, %v995_v57, %v1133_v43 }
 0x195   :  { %1135 = vst [vmem:[#allocation9] sm:$0xff] %v1134_v15 }
 0x196   :  { %1159 = dma.vmem_to_hbm [thread:$0]  %s1155_s29, 128, %s1157_s5, [#allocation10]  }
 0x197   :  { %1504 = dma.done.wait [#allocation5], 8192  }
 0x198   :  { %1505 = vsyncadd [#allocation5], 4294959104 }
 0x199   :  { %1506 = dma.done.wait [#allocation10], 128  }
 0x19a   :  { %1507 = vsyncadd [#allocation10], 4294967168 }
 0x19b   :  { %1168 = vsyncpa [#allocation4], 1 }
 0x19c   :  { %1169 = vsyncpa [#allocation7], 1 }
 0x19d   :  { %1170 = vsyncpa [#allocation5], 1 }
 0x19e   :  { %1171 = vsyncpa [#allocation10], 1 }

</bundles_post_ra>
